<compile_context>
chip_gen: v5e
topology: v5e:2x2
jax: 0.10.0
libtpu: 0.0.40
codegen_flags: <defaults>
</compile_context>

<pallas_src>
import jax
import jax.numpy as jnp
from jax.experimental import pallas as pl
from jax.experimental.pallas import tpu as pltpu

_NEG = -1e30                 # bias on padded class lanes -> exp() underflows to 0
_NO_GRID_MAX_ROWS = 4096     # single-call (no grid) path up to this many batch rows
_DEFAULT_TB = 2048           # default batch tile for the grid path (review: 1K-4K)


# ----------------------------- kernel ----------------------------------------

def _log_softmax(s):
    m = jnp.max(s, axis=-1, keepdims=True)
    z = s - m
    lse = jnp.log(jnp.sum(jnp.exp(z), axis=-1, keepdims=True))
    return z - lse


def head_kernel(x_ref, w1_ref, w2_ref, bias_ref, out_ref):
    # x: (TB, K), w1: (K, Hp), w2: (Hp, NCp), bias: (2, L), out: (TB, NCp)
    hp = w1_ref.shape[1]
    ncp = w2_ref.shape[1]
    b1 = bias_ref[0:1, 0:hp]          # (1, Hp)   real bias + 0 in pad lanes
    b2 = bias_ref[1:2, 0:ncp]         # (1, NCp)  real bias + -1e30 in pad lanes
    h = jnp.dot(x_ref[...], w1_ref[...], preferred_element_type=jnp.float32) + b1
    h = jnp.maximum(h, 0.0)           # ReLU
    s = jnp.dot(h, w2_ref[...], preferred_element_type=jnp.float32) + b2
    out_ref[...] = _log_softmax(s)    # exp/log -> EUP, reductions -> XLU (free slots)


# ----------------------------- packing (one-time) ------------------------------

def _round_up(n, m):
    return ((n + m - 1) // m) * m


def _pack_head(w1t, b1, w2t, b2):
    """Pad (in,out)-layout weights to 128-lane multiples; pack both biases.

    Runs ONCE in make_post_process -- hoisted out of the per-call forward path.
    """
    k, h = w1t.shape
    nc = w2t.shape[1]
    hp = _round_up(h, 128)
    ncp = _round_up(nc, 128)
    lanes = max(hp, ncp)
    w1p = jnp.zeros((k, hp), jnp.float32).at[:, :h].set(w1t.astype(jnp.float32))
    w2p = jnp.zeros((hp, ncp), jnp.float32).at[:h, :nc].set(w2t.astype(jnp.float32))
    biasp = jnp.full((2, lanes), _NEG, jnp.float32)
    biasp = biasp.at[0, :].set(0.0).at[0, :h].set(b1.astype(jnp.float32))
    biasp = biasp.at[1, :nc].set(b2.astype(jnp.float32))
    return w1p, w2p, biasp, nc


# ----------------------------- pallas_call wrapper ------------------------------

def _call_head(x, w1p, w2p, biasp, nc, block_b=None):
    b, k = x.shape
    hp = w1p.shape[1]
    ncp = w2p.shape[1]

    limit = _NO_GRID_MAX_ROWS if block_b is None else block_b
    if b <= limit:
        # Single no-grid call: on single-TC parts (v5e/v6e) a serial grid is
        # pure per-step overhead for an overhead-bound head, so keep one call.
        vmem = pl.BlockSpec(memory_space=pltpu.MemorySpace.VMEM)
        out = pl.pallas_call(
            head_kernel,
            out_shape=jax.ShapeDtypeStruct((b, ncp), jnp.float32),
            in_specs=[vmem] * 4,
            out_specs=vmem,
        )(x, w1p, w2p, biasp)
        return out[:, :nc]

    # Batch-tiled path (large B): 1-D "parallel" grid over batch rows so v7x
    # can shard steps across its two TensorCores. Use large tiles (>=1K rows)
    # so the ~0.35 us per-step pipeline overhead is amortized, keep >= 2 steps,
    # and size tiles so padding is minimal.
    tb_req = _DEFAULT_TB if block_b is None else block_b
    n_steps = max(2, pl.cdiv(b, tb_req))
    tb = _round_up(pl.cdiv(b, n_steps), 8)
    n_steps = pl.cdiv(b, tb)
    bp = n_steps * tb
    if bp != b:
        x = jnp.pad(x, ((0, bp - b), (0, 0)))

    # Scoped-VMEM budget: double-buffered x/out tiles + single-buffered weights.
    # (Covers v5e's 16 MiB scoped default when tb is large; safe on v7x's 64 MiB.)
    need = (2 * tb * (k + ncp) + (k * hp + hp * ncp + biasp.size)) * 4
    vmem_limit = min(max(int(need * 1.5) + (2 << 20), 32 << 20), 64 << 20)

    # Whole-array VMEM-resident weights: a single copy, never re-fetched and
    # never double-buffered (the single-buffering requested by the review).
    resident = pl.BlockSpec(memory_space=pltpu.MemorySpace.VMEM)

    out = pl.pallas_call(
        head_kernel,
        out_shape=jax.ShapeDtypeStruct((bp, ncp), jnp.float32),
        grid=(n_steps,),
        in_specs=[
            pl.BlockSpec((tb, k), lambda i: (i, 0)),   # x: batch-tiled, lane-dense
            resident,                                   # w1p
            resident,                                   # w2p
            resident,                                   # biasp
        ],
        out_specs=pl.BlockSpec((tb, ncp), lambda i: (i, 0)),
        compiler_params=pltpu.CompilerParams(
            dimension_semantics=("parallel",),
            vmem_limit_bytes=vmem_limit),
    )(x, w1p, w2p, biasp)
    return out[:b, :nc]


# ----------------------------- public API --------------------------------------

def make_post_process(params, postprocessing="att_mlp", block_b=None):
    """Build the forward function.  All weight packing (attention fusion,
    128-lane padding, bias packing) happens here, once -- not per call."""
    if postprocessing == "att_mlp":
        att = params["attention_layer"]                    # (C1,)
        w1t = params["cls_w1"].T                           # (H, H)  (in, out)
        h = w1t.shape[0]
        c1 = att.shape[0]
        # Fuse the attention contraction into the first Linear:
        #   fused[(h*C1 + c), o] = att[c] * W1.T[h, o]
        # so the whole att_mlp path is two lane-dense MXU matmuls in the kernel.
        w_fused = (w1t[:, None, :] * att[None, :, None]).reshape(h * c1, h)
        w1p, w2p, biasp, nc = _pack_head(
            w_fused, params["cls_b1"], params["cls_w2"].T, params["cls_b2"])
    else:
        w1p, w2p, biasp, nc = _pack_head(
            params["mlp_w1"].T, params["mlp_b1"],
            params["mlp_w2"].T, params["mlp_b2"])

    def fwd(reprs):
        b, hh, cc = reprs.shape
        x = reprs.reshape(b, hh * cc)   # contiguous, lane-dense kernel input
        # TODO(synk): fuse the [:, :nc] column slice into the downstream
        # consumer (loss) to avoid re-reading the 128-lane padded logits at large B.
        return _call_head(x, w1p, w2p, biasp, nc, block_b=block_b)

    return jax.jit(fwd)


# --------------------------- parameter init ------------------------------------

def init_params(key, hidden_dim, cells_num, num_classes):
    """Deterministic synthetic init (xavier-uniform style), PyTorch (out,in) layout."""
    c1 = cells_num + 1
    ks = jax.random.split(key, 9)

    def xavier(k, shape):  # shape = (out, in)
        fan_out, fan_in = shape
        bound = (6.0 / (fan_in + fan_out)) ** 0.5
        return jax.random.uniform(k, shape, jnp.float32, -bound, bound)

    def bias(k, n, fan_in):
        bound = 1.0 / (fan_in ** 0.5)
        return jax.random.uniform(k, (n,), jnp.float32, -bound, bound)

    return {
        # nn.Parameter(zeros(c1)) xavier-init'd through a (c1, 1) view
        "attention_layer": xavier(ks[0], (c1, 1)).reshape(c1),
        # classfier = Linear(H, H) -> ReLU -> Linear(H, NC)
        "cls_w1": xavier(ks[1], (hidden_dim, hidden_dim)),
        "cls_b1": bias(ks[2], hidden_dim, hidden_dim),
        "cls_w2": xavier(ks[3], (num_classes, hidden_dim)),
        "cls_b2": bias(ks[4], num_classes, hidden_dim),
        # mlp = Linear(H*C1, H) -> ReLU -> Linear(H, NC)
        "mlp_w1": xavier(ks[5], (hidden_dim, hidden_dim * c1)),
        "mlp_b1": bias(ks[6], hidden_dim, hidden_dim * c1),
        "mlp_w2": xavier(ks[7], (num_classes, hidden_dim)),
        "mlp_b2": bias(ks[8], num_classes, hidden_dim),
    }


# ------------------------------ reference --------------------------------------

def post_process_ref(reprs, params, postprocessing="att_mlp"):
    b, h, c1 = reprs.shape
    if postprocessing == "att_mlp":
        x = reprs @ params["attention_layer"]
        hh = jnp.maximum(x @ params["cls_w1"].T + params["cls_b1"], 0.0)
        s = hh @ params["cls_w2"].T + params["cls_b2"]
    else:
        x = reprs.reshape(-1, h * c1)
        hh = jnp.maximum(x @ params["mlp_w1"].T + params["mlp_b1"], 0.0)
        s = hh @ params["mlp_w2"].T + params["mlp_b2"]
    return jax.nn.log_softmax(s, axis=-1)


# -------------------------------- main ------------------------------------------

if __name__ == "__main__":
    # Pin full-precision f32 matmuls globally so the in-kernel dots and the XLA
    # reference use the same precision -> tight comparison.
    jax.config.update("jax_default_matmul_precision", "highest")

    hidden_dim, cells_num, num_classes, batch = 32, 3, 4, 8
    c1 = cells_num + 1

    key = jax.random.PRNGKey(0)
    k_reprs, k_params, k_big = jax.random.split(key, 3)
    reprs = jax.random.normal(k_reprs, (batch, hidden_dim, c1), dtype=jnp.float32)
    params = init_params(k_params, hidden_dim, cells_num, num_classes)

    ok = True

    # Small batch -> single no-grid call (weight packing hoisted into make_*)
    for mode in ("att_mlp", "mlp"):
        fwd = make_post_process(params, postprocessing=mode)
        logits = jax.block_until_ready(fwd(reprs))
        ref = post_process_ref(reprs, params, postprocessing=mode)
        if logits.shape != ref.shape or not jnp.allclose(logits, ref, atol=1e-4, rtol=1e-4):
            ok = False
            print(f"MISMATCH in mode {mode}: max abs err "
                  f"{float(jnp.max(jnp.abs(logits - ref)))}")

    # Larger batch with an explicit block_b to exercise the batch-tiled
    # ("parallel" grid, >= 2 steps) path.
    big = jax.random.normal(k_big, (2048, hidden_dim, c1), dtype=jnp.float32)
    for mode in ("att_mlp", "mlp"):
        fwd = make_post_process(params, postprocessing=mode, block_b=1024)
        logits = jax.block_until_ready(fwd(big))
        ref = post_process_ref(big, params, postprocessing=mode)
        if logits.shape != ref.shape or not jnp.allclose(logits, ref, atol=1e-4, rtol=1e-4):
            ok = False
            print(f"MISMATCH (grid) in mode {mode}: max abs err "
                  f"{float(jnp.max(jnp.abs(logits - ref)))}")

    if ok:
        print("KERNEL_OK")
</pallas_src>

<mosaic_0001>
module attributes {stable_mosaic.version = 11 : i64} {
  func.func @head_kernel(%arg0: memref<8x128xf32, #tpu.memory_space<vmem>>, %arg1: memref<128x128xf32, #tpu.memory_space<vmem>>, %arg2: memref<128x128xf32, #tpu.memory_space<vmem>>, %arg3: memref<2x128xf32, #tpu.memory_space<vmem>>, %arg4: memref<8x128xf32, #tpu.memory_space<vmem>>) attributes {dimension_semantics = [], scalar_prefetch = 0 : i64, scratch_operands = 0 : i64, tpu.core_type = #tpu.core_type<tc>} {
    %c0 = arith.constant 0 : index
    %c0_0 = arith.constant 0 : index
    %0 = vector.load %arg3[%c0, %c0_0] : memref<2x128xf32, #tpu.memory_space<vmem>>, vector<1x128xf32>
    %c1 = arith.constant 1 : index
    %c0_1 = arith.constant 0 : index
    %1 = vector.load %arg3[%c1, %c0_1] : memref<2x128xf32, #tpu.memory_space<vmem>>, vector<1x128xf32>
    %c0_2 = arith.constant 0 : index
    %c0_3 = arith.constant 0 : index
    %2 = vector.load %arg0[%c0_2, %c0_3] : memref<8x128xf32, #tpu.memory_space<vmem>>, vector<8x128xf32>
    %c0_4 = arith.constant 0 : index
    %c0_5 = arith.constant 0 : index
    %3 = vector.load %arg1[%c0_4, %c0_5] : memref<128x128xf32, #tpu.memory_space<vmem>>, vector<128x128xf32>
    %cst = arith.constant dense<0.000000e+00> : vector<8x128xf32>
    %4 = tpu.matmul %2, %3, %cst {dimension_numbers = #tpu.dot_dimension_numbers<[1], [0], [0], [1], [0, 0, 1, 1], [], []>, precision = #tpu.contract_precision<fp32>} : vector<8x128xf32>, vector<128x128xf32>, vector<8x128xf32> -> vector<8x128xf32>
    %5 = vector.broadcast %0 : vector<1x128xf32> to vector<8x128xf32>
    %6 = arith.addf %4, %5 : vector<8x128xf32>
    %cst_6 = arith.constant 0.000000e+00 : f32
    %7 = vector.broadcast %cst_6 : f32 to vector<8x128xf32>
    %8 = arith.maximumf %6, %7 : vector<8x128xf32>
    %c0_7 = arith.constant 0 : index
    %c0_8 = arith.constant 0 : index
    %9 = vector.load %arg2[%c0_7, %c0_8] : memref<128x128xf32, #tpu.memory_space<vmem>>, vector<128x128xf32>
    %cst_9 = arith.constant dense<0.000000e+00> : vector<8x128xf32>
    %10 = tpu.matmul %8, %9, %cst_9 {dimension_numbers = #tpu.dot_dimension_numbers<[1], [0], [0], [1], [0, 0, 1, 1], [], []>, precision = #tpu.contract_precision<fp32>} : vector<8x128xf32>, vector<128x128xf32>, vector<8x128xf32> -> vector<8x128xf32>
    %11 = vector.broadcast %1 : vector<1x128xf32> to vector<8x128xf32>
    %12 = arith.addf %10, %11 : vector<8x128xf32>
    %cst_10 = arith.constant dense<0xFF800000> : vector<8xf32>
    %13 = vector.multi_reduction <maximumf>, %12, %cst_10 [1] : vector<8x128xf32> to vector<8xf32>
    %14 = vector.shape_cast %13 : vector<8xf32> to vector<8x1xf32>
    %15 = vector.broadcast %14 : vector<8x1xf32> to vector<8x128xf32>
    %16 = arith.subf %12, %15 : vector<8x128xf32>
    %17 = math.exp %16 : vector<8x128xf32>
    %cst_11 = arith.constant dense<0.000000e+00> : vector<8xf32>
    %18 = vector.multi_reduction <add>, %17, %cst_11 [1] : vector<8x128xf32> to vector<8xf32>
    %19 = vector.shape_cast %18 : vector<8xf32> to vector<8x1xf32>
    %20 = math.log %19 : vector<8x1xf32>
    %21 = vector.broadcast %20 : vector<8x1xf32> to vector<8x128xf32>
    %22 = arith.subf %16, %21 : vector<8x128xf32>
    %c0_12 = arith.constant 0 : index
    %c0_13 = arith.constant 0 : index
    %23 = vector.load %arg4[%c0_12, %c0_13] : memref<8x128xf32, #tpu.memory_space<vmem>>, vector<8x128xf32>
    tpu.vector_store %arg4[%c0_12, %c0_13], %22 {strides = array<i32>} : memref<8x128xf32, #tpu.memory_space<vmem>>, vector<8x128xf32>,
    return
  }
}

</mosaic_0001>

<bundles_post_ra>
// kernel: fwd.1
= control target key start
LH: loop header
LB: loop body
LE: loop exit
PB: predicated region body
PF: predicated region fallthrough
CT: control target
= control target key end

     0   :  { %s1377_s1 = inlined_call_operand.vmem [shape: f32[128,128], index: 1, kind: input, shape index: {}]   ;;  %s1378_s3 = inlined_call_operand.vmem [shape: f32[2,128], index: 3, kind: input, shape index: {}]   ;;  %s1379_s0 = inlined_call_operand.vmem [shape: f32[8,128], index: 0, kind: input, shape index: {}]   ;;  %s1380_s2 = inlined_call_operand.vmem [shape: f32[128,128], index: 2, kind: input, shape index: {}]   ;;  %s1381_s4 = inlined_call_operand.vmem [shape: f32[8,128], index: 4, kind: output, shape index: {}]  }
   0x1   :  { %v35_v0 = vld [vmem:[%s1377_s1 + $0x78] sm:$0xff]  ;;  %v34_v1 = vld [vmem:[%s1377_s1 + $0x70] sm:$0xff]  ;;  %v33_v2 = vld [vmem:[%s1377_s1 + $0x68] sm:$0xff] }
   0x2   :  { %v792_v3 = vand.u32 4294901760, %v35_v0  ;;  %v794_v4 = vand.u32 4294901760, %v34_v1  ;;  %v796_v5 = vand.u32 4294901760, %v33_v2  ;;  %v32_v6 = vld [vmem:[%s1377_s1 + $0x60] sm:$0xff]  ;;  %v31_v7 = vld [vmem:[%s1377_s1 + $0x58] sm:$0xff]  ;;  %v30_v8 = vld [vmem:[%s1377_s1 + $0x50] sm:$0xff] }
   0x3   :  { %v807_v9 = vand.u32 4294901760, %v32_v6  ;;  %v809_v10 = vand.u32 4294901760, %v31_v7  ;;  %v811_v11 = vand.u32 4294901760, %v30_v8  ;;  %v29_v12 = vld [vmem:[%s1377_s1 + $0x48] sm:$0xff]  ;;  %v28_v13 = vld [vmem:[%s1377_s1 + $0x40] sm:$0xff]  ;;  %v27_v21 = vld [vmem:[%s1377_s1 + $0x38] sm:$0xff] }
   0x4   :  { %38 = vmatpush.msra.mxu0 %v792_v3  ;;  %v821_v14 = vsub.f32 %v35_v0, %v792_v3  ;;  %v824_v15 = vsub.f32 %v34_v1, %v794_v4  ;;  %v827_v16 = vsub.f32 %v33_v2, %v796_v5  ;;  %v829_v17 = vand.u32 4294901760, %v29_v12  ;;  %234 = vmatpush.msra.mxu3 %v792_v3  ;;  %v26_v34 = vld [vmem:[%s1377_s1 + $0x30] sm:$0xff]  ;;  %v25_v35 = vld [vmem:[%s1377_s1 + $0x28] sm:$0xff]  ;;  %v24_v42 = vld [vmem:[%s1377_s1 + $0x20] sm:$0xff] }
   0x5   :  { %v833_v18 = vsub.f32 %v32_v6, %v807_v9  ;;  %v836_v19 = vsub.f32 %v31_v7, %v809_v10  ;;  %v838_v20 = vand.u32 4294901760, %v28_v13  ;;  %v848_v25 = vsub.f32 %v30_v8, %v811_v11  ;;  %v23_v47 = vld [vmem:[%s1377_s1 + $0x18] sm:$0xff]  ;;  %v22_v53 = vld [vmem:[%s1377_s1 + $0x10] sm:$0xff]  ;;  %v21_v61 = vld [vmem:[%s1377_s1 + $0x8] sm:$0xff] }
   0x6   :  { %40 = vmatpush.msra.mxu0 %v794_v4  ;;  %v80_v22 = vand.u32 4294901760, %v821_v14  ;;  %v86_v23 = vand.u32 4294901760, %v824_v15  ;;  %v92_v24 = vand.u32 4294901760, %v827_v16  ;;  %181 = vmatpush.msra.mxu2 %v821_v14  ;;  %v854_v28 = vsub.f32 %v29_v12, %v829_v17  ;;  %v20_v2 = vld [vmem:[%s1377_s1] sm:$0xff] }
   0x7   :  { %v98_v26 = vand.u32 4294901760, %v833_v18  ;;  %v104_v27 = vand.u32 4294901760, %v836_v19  ;;  %236 = vmatpush.msra.mxu3 %v794_v4  ;;  %v867_v32 = vand.u32 4294901760, %v27_v21  ;;  %v871_v33 = vsub.f32 %v28_v13, %v838_v20 }
   0x8   :  { %v81_v29 = vsub.f32 %v821_v14, %v80_v22  ;;  %42 = vmatpush.msra.mxu0 %v796_v5  ;;  %v87_v30 = vsub.f32 %v824_v15, %v86_v23  ;;  %v93_v31 = vsub.f32 %v827_v16, %v92_v24  ;;  %184 = vmatpush.msra.mxu2 %v824_v15  ;;  %v110_v39 = vand.u32 4294901760, %v848_v25  ;;  %v394_v14 = vld [vmem:[%s1380_s2 + $0x78] sm:$0xff]  ;;  %v393_v15 = vld [vmem:[%s1380_s2 + $0x70] sm:$0xff] }
   0x9   :  { %238 = vmatpush.msra.mxu3 %v796_v5  ;;  %v99_v38 = vsub.f32 %v833_v18, %v98_v26  ;;  %v105_v40 = vsub.f32 %v836_v19, %v104_v27  ;;  %v116_v41 = vand.u32 4294901760, %v854_v28  ;;  %v895_v44 = vand.u32 4294901760, %v26_v34 }
   0xa   :  { %v82_v36 = vand.u32 4294901760, %v81_v29  ;;  %v88_v37 = vand.u32 4294901760, %v87_v30  ;;  %44 = vmatpush.msra.mxu0 %v807_v9  ;;  %187 = vmatpush.msra.mxu2 %v827_v16  ;;  %v94_v43 = vand.u32 4294901760, %v93_v31  ;;  %v898_v45 = vsub.f32 %v27_v21, %v867_v32  ;;  %v19_v29 = vld [vmem:[%s1379_s0] sm:$0xff]  ;;  %v392_v16 = vld [vmem:[%s1380_s2 + $0x68] sm:$0xff] }
   0xb   :  { %240 = vmatpush.msra.mxu3 %v807_v9  ;;  %v900_v46 = vand.u32 4294901760, %v25_v35  ;;  %v122_v48 = vand.u32 4294901760, %v871_v33  ;;  %v100_v49 = vand.u32 4294901760, %v99_v38  ;;  %v111_v50 = vsub.f32 %v848_v25, %v110_v39 }
   0xc   :  { %83 = vmatpush.msra.mxu1 %v82_v36  ;;  %46 = vmatpush.msra.mxu0 %v809_v10  ;;  %v913_v51 = vsub.f32 %v26_v34, %v895_v44  ;;  %v915_v52 = vand.u32 4294901760, %v24_v42  ;;  %v920_v54 = vand.u32 4294901760, %v23_v47  ;;  %v106_v55 = vand.u32 4294901760, %v105_v40 }
   0xd   :  { %190 = vmatpush.msra.mxu2 %v833_v18  ;;  %242 = vmatpush.msra.mxu3 %v809_v10  ;;  %v117_v56 = vsub.f32 %v854_v28, %v116_v41  ;;  %v128_v57 = vand.u32 4294901760, %v898_v45  ;;  %v930_v58 = vsub.f32 %v25_v35, %v900_v46  ;;  %v123_v59 = vsub.f32 %v871_v33, %v122_v48 }
   0xe   :  { %89 = vmatpush.msra.mxu1 %v88_v37  ;;  %48 = vmatpush.msra.mxu0 %v811_v11  ;;  %v935_v60 = vand.u32 4294901760, %v22_v53  ;;  %v112_v62 = vand.u32 4294901760, %v111_v50  ;;  %v134_v63 = vand.u32 4294901760, %v913_v51  ;;  %v945_v0 = vsub.f32 %v24_v42, %v915_v52 }
   0xf   :  { %193 = vmatpush.msra.mxu2 %v836_v19  ;;  %244 = vmatpush.msra.mxu3 %v811_v11  ;;  %v948_v1 = vsub.f32 %v23_v47, %v920_v54  ;;  %v118_v6 = vand.u32 4294901760, %v117_v56  ;;  %v129_v7 = vsub.f32 %v898_v45, %v128_v57  ;;  %v140_v8 = vand.u32 4294901760, %v930_v58 }
  0x10   :  { %95 = vmatpush.msra.mxu1 %v94_v43  ;;  %50 = vmatpush.msra.mxu0 %v829_v17  ;;  %v960_v12 = vand.u32 4294901760, %v21_v61  ;;  %v124_v13 = vand.u32 4294901760, %v123_v59  ;;  %v963_v21 = vsub.f32 %v22_v53, %v935_v60  ;;  %v135_v30 = vsub.f32 %v913_v51, %v134_v63 }
  0x11   :  { %196 = vmatpush.msra.mxu2 %v848_v25  ;;  %246 = vmatpush.msra.mxu3 %v829_v17  ;;  %v146_v31 = vand.u32 4294901760, %v945_v0  ;;  %v975_v34 = vand.u32 4294901760, %v20_v2  ;;  %v977_v35 = vand.u32 4294901760, %v19_v29  ;;  %v152_v36 = vand.u32 4294901760, %v948_v1 }
  0x12   :  { %101 = vmatpush.msra.mxu1 %v100_v49  ;;  %52 = vmatpush.msra.mxu0 %v838_v20  ;;  %v130_v37 = vand.u32 4294901760, %v129_v7  ;;  %v141_v38 = vsub.f32 %v930_v58, %v140_v8  ;;  %v987_v40 = vsub.f32 %v21_v61, %v960_v12  ;;  %v136_v43 = vand.u32 4294901760, %v135_v30 }
  0x13   :  { %199 = vmatpush.msra.mxu2 %v854_v28  ;;  %248 = vmatpush.msra.mxu3 %v838_v20  ;;  %v70_v42 = vsub.f32 %v19_v29, %v977_v35  ;;  %v147_v47 = vsub.f32 %v945_v0, %v146_v31  ;;  %v158_v49 = vand.u32 4294901760, %v963_v21  ;;  %v998_v50 = vsub.f32 %v20_v2, %v975_v34 }
  0x14   :  { %107 = vmatpush.msra.mxu1 %v106_v55  ;;  %54 = vmatpush.msra.mxu0 %v867_v32  ;;  %v142_v53 = vand.u32 4294901760, %v141_v38  ;;  %v153_v55 = vsub.f32 %v948_v1, %v152_v36  ;;  %v164_v56 = vand.u32 4294901760, %v987_v40  ;;  %v1049_v18 = vand.u32 4294901760, %v394_v14 }
  0x15   :  { %202 = vmatpush.msra.mxu2 %v871_v33  ;;  %250 = vmatpush.msra.mxu3 %v867_v32  ;;  %v71_v59 = vand.u32 4294901760, %v70_v42  ;;  %v148_v61 = vand.u32 4294901760, %v147_v47  ;;  %v170_v2 = vand.u32 4294901760, %v998_v50  ;;  %v388_v47 = vld [vmem:[%s1380_s2 + $0x48] sm:$0xff]  ;;  %v386_v33 = vld [vmem:[%s1380_s2 + $0x38] sm:$0xff] }
  0x16   :  { %113 = vmatpush.msra.mxu1 %v112_v62  ;;  %56 = vmatpush.msra.mxu0 %v895_v44  ;;  %v159_v62 = vsub.f32 %v963_v21, %v158_v49  ;;  %v165_v7 = vsub.f32 %v987_v40, %v164_v56 }
  0x17   :  { %205 = vmatpush.msra.mxu2 %v898_v45  ;;  %252 = vmatpush.msra.mxu3 %v895_v44  ;;  %v171_v30 = vsub.f32 %v998_v50, %v170_v2  ;;  %v1152_v45 = vand.u32 4294901760, %v386_v33 }
  0x18   :  { %119 = vmatpush.msra.mxu1 %v118_v6  ;;  %58 = vmatpush.msra.mxu0 %v900_v46  ;;  %v154_v6 = vand.u32 4294901760, %v153_v55  ;;  %v160_v29 = vand.u32 4294901760, %v159_v62  ;;  %v1081_v55 = vsub.f32 %v394_v14, %v1049_v18  ;;  %v1089_v62 = vand.u32 4294901760, %v388_v47  ;;  %v384_v14 = vld [vmem:[%s1380_s2 + $0x28] sm:$0xff] }
  0x19   :  { %208 = vmatpush.msra.mxu2 %v913_v51  ;;  %254 = vmatpush.msra.mxu3 %v900_v46 }
  0x1a   :  { %125 = vmatpush.msra.mxu1 %v124_v13  ;;  %60 = vmatpush.msra.mxu0 %v915_v52  ;;  %v72_v13 = vsub.f32 %v70_v42, %v71_v59  ;;  %v439_v25 = vand.u32 4294901760, %v1081_v55 }
  0x1b   :  { %211 = vmatpush.msra.mxu2 %v930_v58  ;;  %256 = vmatpush.msra.mxu3 %v915_v52 }
  0x1c   :  { %131 = vmatpush.msra.mxu1 %v130_v37  ;;  %62 = vmatpush.msra.mxu0 %v920_v54  ;;  %v166_v37 = vand.u32 4294901760, %v165_v7  ;;  %v73_v38 = vand.u32 4294901760, %v72_v13 }
  0x1d   :  { %214 = vmatpush.msra.mxu2 %v945_v0  ;;  %258 = vmatpush.msra.mxu3 %v920_v54 }
  0x1e   :  { %137 = vmatpush.msra.mxu1 %v136_v43  ;;  %64 = vmatpush.msra.mxu0 %v935_v60  ;;  %v172_v43 = vand.u32 4294901760, %v171_v30 }
  0x1f   :  { %217 = vmatpush.msra.mxu2 %v948_v1  ;;  %260 = vmatpush.msra.mxu3 %v935_v60 }
  0x20   :  { %143 = vmatpush.msra.mxu1 %v142_v53  ;;  %66 = vmatpush.msra.mxu0 %v960_v12  ;;  %v387_v53 = vld [vmem:[%s1380_s2 + $0x40] sm:$0xff] }
  0x21   :  { %220 = vmatpush.msra.mxu2 %v963_v21  ;;  %262 = vmatpush.msra.mxu3 %v960_v12  ;;  %v1104_v13 = vand.u32 4294901760, %v387_v53 }
  0x22   :  { %149 = vmatpush.msra.mxu1 %v148_v61  ;;  %68 = vmatpush.msra.mxu0 %v975_v34 }
  0x23   :  { %223 = vmatpush.msra.mxu2 %v987_v40  ;;  %264 = vmatpush.msra.mxu3 %v975_v34 }
  0x24   :  { %275 = vmatpush.msrb.mxu0 %v80_v22  ;;  %155 = vmatpush.msra.mxu1 %v154_v6  ;;  %v1051_v22 = vand.u32 4294901760, %v393_v15 }
  0x25   :  { %226 = vmatpush.msra.mxu2 %v998_v50  ;;  %268 = vmatmul.f32.vlgmr.msra.gmra.mxu3 %v71_v59 }
  0x26   :  { %279 = vmatpush.msrb.mxu0 %v86_v23  ;;  %161 = vmatpush.msra.mxu1 %v160_v29  ;;  %v1053_v23 = vand.u32 4294901760, %v392_v16  ;;  %v1084_v59 = vsub.f32 %v393_v15, %v1051_v22 }
  0x27   :  { %229 = vmatmul.f32.vlgmr.msra.gmra.mxu2 %v70_v42  ;;  %74 = vmatmul.f32.vlgmr.msra.gmra.mxu0 %v73_v38 }
  0x28   :  { %283 = vmatpush.msrb.mxu0 %v92_v24  ;;  %167 = vmatpush.msra.mxu1 %v166_v37  ;;  %v391_v24 = vld [vmem:[%s1380_s2 + $0x60] sm:$0xff]  ;;  %v1087_v61 = vsub.f32 %v392_v16, %v1053_v23 }
  0x29   :  { %v1065_v19 = vand.u32 4294901760, %v391_v24  ;;  %397 = vmatpush.msrb.mxu2 %v1049_v18 }
  0x2a   :  { %287 = vmatpush.msrb.mxu0 %v98_v26  ;;  %173 = vmatpush.msra.mxu1 %v172_v43  ;;  %v390_v26 = vld [vmem:[%s1380_s2 + $0x58] sm:$0xff]  ;;  %v451_v7 = vand.u32 4294901760, %v1087_v61  ;;  %v1138_v43 = vsub.f32 %v387_v53, %v1104_v13 }
  0x2b   :  { %175 = vmatmul.f32.vlgmr.msra.gmra.mxu1 %v977_v35  ;;  %v1092_v6 = vsub.f32 %v391_v24, %v1065_v19  ;;  %399 = vmatpush.msrb.mxu2 %v1051_v22  ;;  %v382_v53 = vld [vmem:[%s1380_s2 + $0x18] sm:$0xff] }
  0x2c   :  { %342 = vmatpush.msrb.mxu1 %v792_v3  ;;  %291 = vmatpush.msrb.mxu0 %v104_v27  ;;  %v389_v3 = vld [vmem:[%s1380_s2 + $0x50] sm:$0xff]  ;;  %v1067_v27 = vand.u32 4294901760, %v390_v26  ;;  %v452_v37 = vsub.f32 %v1087_v61, %v451_v7  ;;  %v481_v51 = vand.u32 4294901760, %v1138_v43 }
  0x2d   :  { %v1069_v42 = vand.u32 4294901760, %v389_v3  ;;  %v457_v29 = vand.u32 4294901760, %v1092_v6  ;;  %401 = vmatpush.msrb.mxu2 %v1053_v23 }
  0x2e   :  { %344 = vmatpush.msrb.mxu1 %v794_v4  ;;  %295 = vmatpush.msrb.mxu0 %v110_v39  ;;  %v1096_v4 = vsub.f32 %v390_v26, %v1067_v27  ;;  %v445_v39 = vand.u32 4294901760, %v1084_v59  ;;  %v383_v26 = vld [vmem:[%s1380_s2 + $0x20] sm:$0xff]  ;;  %v482_v0 = vsub.f32 %v1138_v43, %v481_v51 }
  0x2f   :  { %v1109_v30 = vsub.f32 %v389_v3, %v1069_v42  ;;  %v458_v16 = vsub.f32 %v1092_v6, %v457_v29  ;;  %403 = vmatpush.msrb.mxu2 %v1065_v19  ;;  %v453_v3 = vand.u32 4294901760, %v452_v37  ;;  %v1182_v58 = vand.u32 4294901760, %v383_v26  ;;  %v381_v37 = vld [vmem:[%s1380_s2 + $0x10] sm:$0xff] }
  0x30   :  { %346 = vmatpush.msrb.mxu1 %v796_v5  ;;  %299 = vmatpush.msrb.mxu0 %v116_v41  ;;  %v440_v5 = vsub.f32 %v1081_v55, %v439_v25  ;;  %v446_v28 = vsub.f32 %v1084_v59, %v445_v39  ;;  %v1121_v41 = vsub.f32 %v388_v47, %v1089_v62  ;;  %v483_v21 = vand.u32 4294901760, %v482_v0 }
  0x31   :  { %v469_v24 = vand.u32 4294901760, %v1109_v30  ;;  %405 = vmatpush.msrb.mxu2 %v1067_v27 }
  0x32   :  { %348 = vmatpush.msrb.mxu1 %v807_v9  ;;  %303 = vmatpush.msrb.mxu0 %v122_v48  ;;  %v463_v9 = vand.u32 4294901760, %v1096_v4  ;;  %v385_v48 = vld [vmem:[%s1380_s2 + $0x30] sm:$0xff]  ;;  %v441_v38 = vand.u32 4294901760, %v440_v5  ;;  %v447_v15 = vand.u32 4294901760, %v446_v28  ;;  %v459_v5 = vand.u32 4294901760, %v458_v16 }
  0x33   :  { %v470_v28 = vsub.f32 %v1109_v30, %v469_v24  ;;  %407 = vmatpush.msrb.mxu2 %v1069_v42  ;;  %v1212_v16 = vsub.f32 %v383_v26, %v1182_v58 }
  0x34   :  { %350 = vmatpush.msrb.mxu1 %v809_v10  ;;  %307 = vmatpush.msrb.mxu0 %v128_v57  ;;  %v475_v10 = vand.u32 4294901760, %v1121_v41  ;;  %v1154_v57 = vand.u32 4294901760, %v385_v48  ;;  %v464_v47 = vsub.f32 %v1096_v4, %v463_v9 }
  0x35   :  { %442 = vmatpush.msrb.mxu3 %v441_v38  ;;  %409 = vmatpush.msrb.mxu2 %v1089_v62 }
  0x36   :  { %352 = vmatpush.msrb.mxu1 %v811_v11  ;;  %311 = vmatpush.msrb.mxu0 %v134_v63  ;;  %v1163_v11 = vand.u32 4294901760, %v384_v14  ;;  %v1170_v63 = vsub.f32 %v386_v33, %v1152_v45  ;;  %v465_v33 = vand.u32 4294901760, %v464_v47 }
  0x37   :  { %448 = vmatpush.msrb.mxu3 %v447_v15  ;;  %v471_v15 = vand.u32 4294901760, %v470_v28  ;;  %411 = vmatpush.msrb.mxu2 %v1104_v13 }
  0x38   :  { %354 = vmatpush.msrb.mxu1 %v829_v17  ;;  %315 = vmatpush.msrb.mxu0 %v140_v8  ;;  %v1180_v17 = vsub.f32 %v385_v48, %v1154_v57  ;;  %v476_v8 = vsub.f32 %v1121_v41, %v475_v10  ;;  %v487_v48 = vand.u32 4294901760, %v1170_v63  ;;  %v1196_v38 = vsub.f32 %v384_v14, %v1163_v11 }
  0x39   :  { %454 = vmatpush.msrb.mxu3 %v453_v3  ;;  %413 = vmatpush.msrb.mxu2 %v1152_v45 }
  0x3a   :  { %356 = vmatpush.msrb.mxu1 %v838_v20  ;;  %319 = vmatpush.msrb.mxu0 %v146_v31  ;;  %v1198_v20 = vand.u32 4294901760, %v382_v53  ;;  %v380_v31 = vld [vmem:[%s1380_s2 + $0x8] sm:$0xff]  ;;  %v493_v14 = vand.u32 4294901760, %v1180_v17  ;;  %v477_v1 = vand.u32 4294901760, %v476_v8  ;;  %v488_v3 = vsub.f32 %v1170_v63, %v487_v48 }
  0x3b   :  { %460 = vmatpush.msrb.mxu3 %v459_v5  ;;  %v499_v26 = vand.u32 4294901760, %v1196_v38  ;;  %v505_v5 = vand.u32 4294901760, %v1212_v16  ;;  %415 = vmatpush.msrb.mxu2 %v1154_v57 }
  0x3c   :  { %358 = vmatpush.msrb.mxu1 %v867_v32  ;;  %323 = vmatpush.msrb.mxu0 %v152_v36  ;;  %v1214_v32 = vand.u32 4294901760, %v381_v37  ;;  %v379_v36 = vld [vmem:[%s1380_s2] sm:$0xff]  ;;  %v1228_v47 = vsub.f32 %v382_v53, %v1198_v20 }
  0x3d   :  { %466 = vmatpush.msrb.mxu3 %v465_v33  ;;  %v1243_v28 = vand.u32 4294901760, %v379_v36  ;;  %v500_v40 = vsub.f32 %v1196_v38, %v499_v26  ;;  %v506_v50 = vsub.f32 %v1212_v16, %v505_v5  ;;  %417 = vmatpush.msrb.mxu2 %v1163_v11 }
  0x3e   :  { %360 = vmatpush.msrb.mxu1 %v895_v44  ;;  %327 = vmatpush.msrb.mxu0 %v158_v49  ;;  %v1230_v44 = vand.u32 4294901760, %v380_v31  ;;  %v494_v49 = vsub.f32 %v1180_v17, %v493_v14  ;;  %v1241_v53 = vsub.f32 %v381_v37, %v1214_v32 }
  0x3f   :  { %472 = vmatpush.msrb.mxu3 %v471_v15  ;;  %v1264_v37 = vsub.f32 %v379_v36, %v1243_v28  ;;  %419 = vmatpush.msrb.mxu2 %v1182_v58 }
  0x40   :  { %362 = vmatpush.msrb.mxu1 %v900_v46  ;;  %331 = vmatpush.msrb.mxu0 %v164_v56  ;;  %v489_v46 = vand.u32 4294901760, %v488_v3  ;;  %v511_v56 = vand.u32 4294901760, %v1228_v47  ;;  %v1254_v8 = vsub.f32 %v380_v31, %v1230_v44  ;;  %v507_v31 = vand.u32 4294901760, %v506_v50 }
  0x41   :  { %478 = vmatpush.msrb.mxu3 %v477_v1  ;;  %v529_v15 = vand.u32 4294901760, %v1264_v37  ;;  %421 = vmatpush.msrb.mxu2 %v1198_v20 }
  0x42   :  { %364 = vmatpush.msrb.mxu1 %v915_v52  ;;  %335 = vmatpush.msrb.mxu0 %v170_v2  ;;  %v495_v52 = vand.u32 4294901760, %v494_v49  ;;  %v517_v2 = vand.u32 4294901760, %v1241_v53  ;;  %v512_v33 = vsub.f32 %v1228_v47, %v511_v56  ;;  %v523_v0 = vand.u32 4294901760, %v1254_v8 }
  0x43   :  { %337 = vmatmul.f32.vlgmr.msrb.gmra.mxu0 %v977_v35  ;;  %484 = vmatpush.msrb.mxu3 %v483_v21 }
  0x44   :  { %366 = vmatpush.msrb.mxu1 %v920_v54  ;;  %540 = vmatpush.msra.mxu0 %v1081_v55  ;;  %v501_v54 = vand.u32 4294901760, %v500_v40  ;;  %v524_v1 = vsub.f32 %v1254_v8, %v523_v0 }
  0x45   :  { %490 = vmatpush.msrb.mxu3 %v489_v46  ;;  %423 = vmatpush.msrb.mxu2 %v1214_v32 }
  0x46   :  { %368 = vmatpush.msrb.mxu1 %v935_v60  ;;  %543 = vmatpush.msra.mxu0 %v1084_v59  ;;  %v518_v60 = vsub.f32 %v1241_v53, %v517_v2 }
  0x47   :  { %496 = vmatpush.msrb.mxu3 %v495_v52  ;;  %425 = vmatpush.msrb.mxu2 %v1230_v44 }
  0x48   :  { %370 = vmatpush.msrb.mxu1 %v960_v12  ;;  %546 = vmatpush.msra.mxu0 %v1087_v61  ;;  %v513_v12 = vand.u32 4294901760, %v512_v33  ;;  %v519_v36 = vand.u32 4294901760, %v518_v60 }
  0x49   :  { %502 = vmatpush.msrb.mxu3 %v501_v54  ;;  %427 = vmatpush.msrb.mxu2 %v1243_v28 }
  0x4a   :  { %372 = vmatpush.msrb.mxu1 %v975_v34  ;;  %549 = vmatpush.msra.mxu0 %v1092_v6  ;;  %v530_v34 = vsub.f32 %v1264_v37, %v529_v15 }
  0x4b   :  { %374 = vmatmul.f32.vlgmr.msrb.gmra.mxu1 %v977_v35  ;;  %508 = vmatpush.msrb.mxu3 %v507_v31  ;;  %v525_v35 = vand.u32 4294901760, %v524_v1 }
  0x4c   :  { %593 = vmatpush.msra.mxu1 %v1049_v18  ;;  %552 = vmatpush.msra.mxu0 %v1096_v4  ;;  %v531_v3 = vand.u32 4294901760, %v530_v34 }
  0x4d   :  { %514 = vmatpush.msrb.mxu3 %v513_v12  ;;  %634 = vmatpush.msra.mxu2 %v439_v25 }
  0x4e   :  { %595 = vmatpush.msra.mxu1 %v1051_v22  ;;  %555 = vmatpush.msra.mxu0 %v1109_v30 }
  0x4f   :  { %520 = vmatpush.msrb.mxu3 %v519_v36  ;;  %638 = vmatpush.msra.mxu2 %v445_v39 }
  0x50   :  { %597 = vmatpush.msra.mxu1 %v1053_v23  ;;  %558 = vmatpush.msra.mxu0 %v1121_v41 }
  0x51   :  { %526 = vmatpush.msrb.mxu3 %v525_v35  ;;  %642 = vmatpush.msra.mxu2 %v451_v7 }
  0x52   :  { %599 = vmatpush.msra.mxu1 %v1065_v19  ;;  %561 = vmatpush.msra.mxu0 %v1138_v43 }
  0x53   :  { %532 = vmatpush.msrb.mxu3 %v531_v3  ;;  %646 = vmatpush.msra.mxu2 %v457_v29 }
  0x54   :  { %601 = vmatpush.msra.mxu1 %v1067_v27  ;;  %564 = vmatpush.msra.mxu0 %v1170_v63 }
  0x55   :  { %701 = vmatpush.msra.mxu3 %v1049_v18  ;;  %650 = vmatpush.msra.mxu2 %v463_v9  ;;  %v752_v18 = vld [vmem:[%s1378_s3] ss:$0 sm:$0xff]  ;;  %v753_v9 = vld [vmem:[%s1378_s3 + $0x1] ss:$0 sm:$0xff] }
  0x56   :  { %603 = vmatpush.msra.mxu1 %v1069_v42  ;;  %567 = vmatpush.msra.mxu0 %v1180_v17 }
  0x57   :  { %703 = vmatpush.msra.mxu3 %v1051_v22  ;;  %654 = vmatpush.msra.mxu2 %v469_v24 }
  0x58   :  { %605 = vmatpush.msra.mxu1 %v1089_v62  ;;  %570 = vmatpush.msra.mxu0 %v1196_v38 }
  0x59   :  { %705 = vmatpush.msra.mxu3 %v1053_v23  ;;  %658 = vmatpush.msra.mxu2 %v475_v10 }
  0x5a   :  { %607 = vmatpush.msra.mxu1 %v1104_v13  ;;  %573 = vmatpush.msra.mxu0 %v1212_v16 }
  0x5b   :  { %707 = vmatpush.msra.mxu3 %v1065_v19  ;;  %662 = vmatpush.msra.mxu2 %v481_v51 }
  0x5c   :  { %609 = vmatpush.msra.mxu1 %v1152_v45  ;;  %576 = vmatpush.msra.mxu0 %v1228_v47 }
  0x5d   :  { %709 = vmatpush.msra.mxu3 %v1067_v27  ;;  %666 = vmatpush.msra.mxu2 %v487_v48 }
  0x5e   :  { %611 = vmatpush.msra.mxu1 %v1154_v57  ;;  %579 = vmatpush.msra.mxu0 %v1241_v53 }
  0x5f   :  { %711 = vmatpush.msra.mxu3 %v1069_v42  ;;  %670 = vmatpush.msra.mxu2 %v493_v14 }
  0x60   :  { %613 = vmatpush.msra.mxu1 %v1163_v11  ;;  %582 = vmatpush.msra.mxu0 %v1254_v8 }
  0x61   :  { %713 = vmatpush.msra.mxu3 %v1089_v62  ;;  %674 = vmatpush.msra.mxu2 %v499_v26 }
  0x62   :  { %615 = vmatpush.msra.mxu1 %v1182_v58  ;;  %585 = vmatpush.msra.mxu0 %v1264_v37 }
  0x63   :  { %715 = vmatpush.msra.mxu3 %v1104_v13  ;;  %678 = vmatpush.msra.mxu2 %v505_v5 }
  0x64   :  { %617 = vmatpush.msra.mxu1 %v1198_v20 }
  0x65   :  { %717 = vmatpush.msra.mxu3 %v1152_v45  ;;  %682 = vmatpush.msra.mxu2 %v511_v56 }
  0x66   :  { %619 = vmatpush.msra.mxu1 %v1214_v32 }
  0x67   :  { %719 = vmatpush.msra.mxu3 %v1154_v57  ;;  %686 = vmatpush.msra.mxu2 %v517_v2 }
  0x68   :  { %621 = vmatpush.msra.mxu1 %v1230_v44 }
  0x69   :  { %721 = vmatpush.msra.mxu3 %v1163_v11  ;;  %690 = vmatpush.msra.mxu2 %v523_v0 }
  0x6a   :  { %623 = vmatpush.msra.mxu1 %v1243_v28 }
  0x6b   :  { %723 = vmatpush.msra.mxu3 %v1182_v58  ;;  %694 = vmatpush.msra.mxu2 %v529_v15 }
  0x6d   :  { %725 = vmatpush.msra.mxu3 %v1198_v20 }
  0x6f   :  { %727 = vmatpush.msra.mxu3 %v1214_v32 }
  0x71   :  { %729 = vmatpush.msra.mxu3 %v1230_v44 }
  0x73   :  { %731 = vmatpush.msra.mxu3 %v1243_v28 }
  0xa4   :  { %v75_v22 = vpop.f32.mrf.mxu0 }
  0xa5   :  { %v76_v23 = vadd.f32 %v752_v18, %v75_v22 }
  0xa8   :  { %v176_v19 = vpop.f32.mrf.mxu1  ;;  %v269_v59 = vpop.f32.mrf.mxu3 }
  0xa9   :  { %v177_v27 = vadd.f32 %v176_v19, %v76_v23 }
  0xaa   :  { %v230_v42 = vpop.f32.mrf.mxu2 }
  0xab   :  { %v231_v55 = vadd.f32 %v230_v42, %v177_v27 }
  0xad   :  { %v270_v61 = vadd.f32 %v269_v59, %v231_v55 }
  0xc0   :  { %v338_v62 = vpop.f32.mrf.mxu0 }
  0xc1   :  { %v339_v6 = vadd.f32 %v338_v62, %v270_v61 }
  0xc8   :  { %v375_v4 = vpop.f32.mrf.mxu1 }
  0xc9   :  { %v376_v25 = vadd.f32 %v375_v4, %v339_v6 }
  0xcb   :  { %v378_v39 = vmax.f32 %v376_v25, 0.0 }
  0xcd   :  { %v428_v7 = vand.u32 4294901760, %v378_v39 }
  0xcf   :  { %v429_v13 = vsub.f32 %v378_v39, %v428_v7  ;;  %534 = vmatmul.f32.vlgmr.msrb.gmra.mxu3 %v428_v7 }
  0xd1   :  { %588 = vmatmul.f32.vlgmr.msra.gmra.mxu0 %v429_v13  ;;  %v430_v29 = vand.u32 4294901760, %v429_v13 }
  0xd3   :  { %627 = vmatmul.f32.vlgmr.msra.gmra.mxu1 %v430_v29  ;;  %v431_v30 = vsub.f32 %v429_v13, %v430_v29 }
  0xd5   :  { %v432_v41 = vand.u32 4294901760, %v431_v30 }
  0xd7   :  { %433 = vmatmul.f32.vlgmr.msrb.gmra.mxu2 %v432_v41  ;;  %733 = vmatmul.f32.vlgmr.msra.gmra.mxu3 %v428_v7 }
  0xdf   :  { %696 = vmatmul.f32.vlgmr.msra.gmra.mxu2 %v428_v7 }
 0x14e   :  { %v589_v57 = vpop.f32.mrf.mxu0 }
 0x150   :  { %v628_v51 = vpop.f32.mrf.mxu1 }
 0x152   :  { %v535_v43 = vpop.f32.mrf.mxu3 }
 0x15a   :  { %v434_v24 = vpop.f32.mrf.mxu2  ;;  %v734_v48 = vpop.f32.mrf.mxu3 }
 0x15b   :  { %v435_v10 = vadd.f32 %v753_v9, %v434_v24 }
 0x15d   :  { %v536_v45 = vadd.f32 %v535_v43, %v435_v10 }
 0x15f   :  { %v590_v11 = vadd.f32 %v589_v57, %v536_v45 }
 0x161   :  { %v629_v63 = vadd.f32 %v628_v51, %v590_v11 }
 0x162   :  { %v697_v17 = vpop.f32.mrf.mxu2 }
 0x163   :  { %v698_v58 = vadd.f32 %v697_v17, %v629_v63 }
 0x165   :  { %v735_v38 = vadd.f32 %v734_v48, %v698_v58 }
 0x167   :  { %737 = vmax.xlane.f32.xlu0 %v735_v38 }
 0x1da   :  { %v738_v20 = vpop.xlane.xlu0 %737 }
 0x1db   :  { %v739_v14 = vsub.f32 %v735_v38, %v738_v20 }
 0x1dd   :  { %v740_v16 = vmul.f32 1.442695, %v739_v14 }
 0x1df   :  { %754 = vpow2.f32 %v740_v16 }
 0x1e5   :  { %v755_v32 = vpop.eup %754 }
 0x1e6   :  { %742 = vadd.xlane.f32.xlu0 %v755_v32 }
 0x259   :  { %v743_v26 = vpop.xlane.xlu0 %742 }
 0x25a   :  { %756 = vlog2.f32 %v743_v26 }
 0x260   :  { %v757_v47 = vpop.eup %756 }
 0x261   :  { %v745_v44 = vmul.f32 0.6931472, %v757_v47 }
 0x263   :  { %v746_v21 = vsub.f32 %v739_v14, %v745_v44 }
 0x265   :  { %747 = vst [vmem:[%s1381_s4] sm:$0xff] %v746_v21 }

</bundles_post_ra>
